<compile_context>
chip_gen: v7x
topology: tpu7x:2x2x1
jax: 0.10.0
libtpu: 0.0.40
codegen_flags: <defaults>
</compile_context>

<pallas_src>
import functools

import jax
import jax.numpy as jnp
import numpy as np
from jax.experimental import pallas as pl
from jax.experimental.pallas import tpu as pltpu


# ---------------------------------------------------------------------------
# Pallas kernel: causal-Toeplitz matmul (the fft_convolve hot path)
# ---------------------------------------------------------------------------
def _toeplitz_matmul_kernel(spec_ref, w_ref, out_ref):
    # spec_ref : (tile_n, T)        bf16 spectrogram rows, one per (batch, event, band)
    # w_ref    : (T, KT_pad)        bf16 stacked causal-Toeplitz bank (VMEM-resident)
    # out_ref  : (tile_n, KT_pad)   lane-dense (multiple-of-128) output slab
    out_ref[...] = jnp.dot(
        spec_ref[...], w_ref[...], preferred_element_type=jnp.float32
    ).astype(out_ref.dtype)


def _round_up(x, m):
    return ((x + m - 1) // m) * m


def _choose_row_tile(n_rows: int, requested: int) -> int:
    """Pick the row tile: as large as requested, but capped so the 'parallel'
    row axis gets >= 2 grid steps (v7x megacore), sublane-aligned for bf16."""
    two_step_cap = _round_up(max(-(-n_rows // 2), 1), 16)
    tile = max(16, min(_round_up(requested, 16), two_step_cap))
    if tile >= n_rows:
        # Single full-extent block (full array dim is always a legal block dim).
        return n_rows
    return tile


def toeplitz_bank_matmul(spec2d, w2d, *, tile_n=2048, out_dtype=jnp.bfloat16):
    """spec2d: (N, T), w2d: (T, K*T) -> (N, K*T) in `out_dtype` (f32 accumulation)."""
    n_rows, t = spec2d.shape
    t2, kt = w2d.shape
    assert t == t2

    # Lane-dense output: pad the K*T column dim to a multiple of 128 so stores
    # are full unmasked vst instead of masked vst.msk partial stores.
    kt_pad = _round_up(kt, 128)
    if kt_pad != kt:
        w2d = jnp.pad(w2d, ((0, 0), (0, kt_pad - kt)))

    # bf16 data streams (f32 accumulation stays inside the kernel).
    spec2d = spec2d.astype(jnp.bfloat16)
    w2d = w2d.astype(jnp.bfloat16)

    tile = _choose_row_tile(n_rows, tile_n)
    grid = (pl.cdiv(n_rows, tile),)  # ragged last block: OOB reads ignored, OOB writes dropped

    out_itemsize = jnp.dtype(out_dtype).itemsize
    vmem_est = (2 * tile * t * 2          # double-buffered bf16 input rows
                + 2 * t * kt_pad * 2      # resident bf16 weight (double-buffer bound)
                + 2 * tile * kt_pad * out_itemsize)  # double-buffered output slab
    vmem_limit = int(min(max(2 * vmem_est + (4 << 20), 32 << 20), 64 << 20))

    out = pl.pallas_call(
        _toeplitz_matmul_kernel,
        out_shape=jax.ShapeDtypeStruct((n_rows, kt_pad), out_dtype),
        grid_spec=pltpu.PrefetchScalarGridSpec(
            num_scalar_prefetch=0,
            grid=grid,
            in_specs=[
                pl.BlockSpec((tile, t), lambda i: (i, 0)),
                # Constant block index => weight DMA'd once, VMEM-resident all grid steps.
                pl.BlockSpec((t, kt_pad), lambda i: (0, 0)),
            ],
            out_specs=pl.BlockSpec((tile, kt_pad), lambda i: (i, 0)),
        ),
        compiler_params=pltpu.CompilerParams(
            dimension_semantics=("parallel",),
            vmem_limit_bytes=vmem_limit,
        ),
    )(spec2d, w2d)

    if kt_pad != kt:
        out = out[:, :kt]
    return out


# ---------------------------------------------------------------------------
# JAX glue: bank construction, Toeplitz matrix, STFT
# ---------------------------------------------------------------------------
def unit_norm(x, axis=-1, eps=1e-8):
    # TODO(synk): unit_norm source not provided; standard L2 row-normalization.
    n = jnp.linalg.norm(x, axis=axis, keepdims=True)
    return x / (n + eps)


def make_bank(n_frames, n_exponents, max_exponent):
    base = jnp.linspace(1.0, 0.0, n_frames, dtype=jnp.float32)[None, :]
    exps = jnp.linspace(2.0, float(max_exponent), n_exponents,
                        dtype=jnp.float32)[:, None]
    return unit_norm(base ** exps)                               # (K, T)


def make_causal_toeplitz(bank):
    # W[tau, k*T + t] = bank[k, t - tau] if t >= tau else 0
    n_exp, n_frames = bank.shape
    idx = jnp.arange(n_frames)
    diff = idx[None, :] - idx[:, None]                            # (T, T)  t - tau
    w = jnp.take(bank, jnp.clip(diff, 0, n_frames - 1), axis=1)   # (K, T, T)
    w = jnp.where(diff[None, :, :] >= 0, w, 0.0)
    return jnp.transpose(w, (1, 0, 2)).reshape(n_frames, n_exp * n_frames)


def stft(audio, window_size, step, pad=True):
    # TODO(synk): stft source not provided; reconstructed as a hann-windowed
    # |rfft| with hop `step`, right-padded so time == n_samples // step.
    if pad:
        audio = jnp.pad(audio, ((0, 0), (0, 0), (0, window_size - step)))
    n_total = audio.shape[-1]
    n_frames = (n_total - window_size) // step + 1
    idx = (jnp.arange(n_frames)[:, None] * step
           + jnp.arange(window_size)[None, :])                    # (time, ws)
    frames = audio[..., idx]                                      # (B, E, time, ws)
    win = 0.5 - 0.5 * jnp.cos(
        2.0 * jnp.pi * jnp.arange(window_size, dtype=jnp.float32) / window_size)
    frames = frames * win
    return jnp.abs(jnp.fft.rfft(frames, axis=-1, norm="ortho"))   # (B, E, time, bands)


# ---------------------------------------------------------------------------
# Full forward (STFT in JAX glue, fft_convolve hot path in Pallas)
# ---------------------------------------------------------------------------
def exponential_transform_forward(audio, *, window_size, step, n_exponents,
                                  n_frames, max_exponent=100.0,
                                  tile_n=2048, out_dtype=jnp.bfloat16):
    batch, n_events, _ = audio.shape
    spec = stft(audio, window_size, step, pad=True)               # (B, E, time, bands)
    _, _, time, bands = spec.shape
    assert time == n_frames, (time, n_frames)

    bank = make_bank(n_frames, n_exponents, max_exponent)         # (K, T)
    w2d = make_causal_toeplitz(bank)                              # (T, K*T)

    # Cast early so the transpose/reshape feeding the kernel moves bf16 bytes.
    spec_cf = jnp.transpose(spec.astype(jnp.bfloat16), (0, 1, 3, 2))
    spec2d = spec_cf.reshape(batch * n_events * bands, time)
    out2d = toeplitz_bank_matmul(spec2d, w2d, tile_n=tile_n,
                                 out_dtype=out_dtype)             # (N, K*T)

    result = out2d.reshape(batch, n_events, bands, n_exponents, time)
    return result.reshape(batch, n_events, bands * n_exponents, time)


# ---------------------------------------------------------------------------
# Pure-JAX reference mirroring the PyTorch fft_convolve path
# ---------------------------------------------------------------------------
def _fft_convolve(a, b):
    n = a.shape[-1]
    a = jnp.pad(a, [(0, 0)] * (a.ndim - 1) + [(0, n)])
    b = jnp.pad(b, [(0, 0)] * (b.ndim - 1) + [(0, b.shape[-1])])
    spec = jnp.fft.rfft(a, axis=-1) * jnp.fft.rfft(b, axis=-1)
    out = jnp.fft.irfft(spec, n=2 * n, axis=-1)
    return out[..., :n]


def _reference(audio, *, window_size, step, n_exponents, n_frames,
               max_exponent=100.0):
    batch, n_events, _ = audio.shape
    spec = stft(audio, window_size, step, pad=True)
    _, _, time, bands = spec.shape
    bank = make_bank(n_frames, n_exponents, max_exponent)
    sp = jnp.transpose(spec, (0, 1, 3, 2))[:, :, :, None, :]      # (B,E,bands,1,T)
    bk = bank[None, None, None, :, :]                             # (1,1,1,K,T)
    res = _fft_convolve(sp, bk)                                   # (B,E,bands,K,T)
    return res.reshape(batch, n_events, bands * n_exponents, time)


if __name__ == "__main__":
    batch = 2
    n_events = 3
    window_size = 64
    step = 32
    n_samples = 512
    n_frames = n_samples // step       # 16
    n_exponents = 4
    max_exponent = 100.0
    bands = window_size // 2 + 1       # 33

    key = jax.random.PRNGKey(0)
    audio = jax.random.normal(key, (batch, n_events, n_samples), dtype=jnp.float32)

    fwd = jax.jit(functools.partial(
        exponential_transform_forward,
        window_size=window_size, step=step, n_exponents=n_exponents,
        n_frames=n_frames, max_exponent=max_exponent))
    out = jax.block_until_ready(fwd(audio))
    assert out.shape == (batch, n_events, bands * n_exponents, n_frames), out.shape

    # Correctness check against the FFT-based reference (the PyTorch formula).
    # Tolerance accounts for the bf16 input/output streams (f32 accumulation);
    # all conv terms are non-negative, so relative error stays well under 2e-2.
    ref = _reference(audio, window_size=window_size, step=step,
                     n_exponents=n_exponents, n_frames=n_frames,
                     max_exponent=max_exponent)
    out_f32 = np.asarray(out).astype(np.float32)
    np.testing.assert_allclose(out_f32, np.asarray(ref), rtol=2e-2, atol=2e-3)

    print("KERNEL_OK")
</pallas_src>

<mosaic_0001>
module attributes {stable_mosaic.version = 11 : i64} {
  func.func @_toeplitz_matmul_kernel(%arg0: i32, %arg1: memref<112x16xbf16, #tpu.memory_space<vmem>>, %arg2: memref<16x128xbf16, #tpu.memory_space<vmem>>, %arg3: memref<112x128xbf16, #tpu.memory_space<vmem>>) attributes {dimension_semantics = [#tpu.dimension_semantics<parallel>], iteration_bounds = array<i64: 2>, scalar_prefetch = 0 : i64, scratch_operands = 0 : i64, tpu.core_type = #tpu.core_type<tc>, window_params = [{transform_indices = @transform_0, window_bounds = array<i64: 112, 16>}, {pipeline_mode = #tpu.pipeline_mode<synchronous>, transform_indices = @transform_1, window_bounds = array<i64: 16, 128>}, {transform_indices = @transform_2, window_bounds = array<i64: 112, 128>}]} {
    %c0 = arith.constant 0 : index
    %c0_0 = arith.constant 0 : index
    %0 = vector.load %arg1[%c0, %c0_0] : memref<112x16xbf16, #tpu.memory_space<vmem>>, vector<112x16xbf16>
    %c0_1 = arith.constant 0 : index
    %c0_2 = arith.constant 0 : index
    %1 = vector.load %arg2[%c0_1, %c0_2] : memref<16x128xbf16, #tpu.memory_space<vmem>>, vector<16x128xbf16>
    %cst = arith.constant dense<0.000000e+00> : vector<112x128xf32>
    %2 = tpu.matmul %0, %1, %cst {dimension_numbers = #tpu.dot_dimension_numbers<[1], [0], [0], [1], [0, 0, 1, 1], [], []>} : vector<112x16xbf16>, vector<16x128xbf16>, vector<112x128xf32> -> vector<112x128xf32>
    %3 = arith.truncf %2 : vector<112x128xf32> to vector<112x128xbf16>
    %c0_3 = arith.constant 0 : index
    %c0_4 = arith.constant 0 : index
    %4 = vector.load %arg3[%c0_3, %c0_4] : memref<112x128xbf16, #tpu.memory_space<vmem>>, vector<112x128xbf16>
    tpu.vector_store %arg3[%c0_3, %c0_4], %3 {strides = array<i32>} : memref<112x128xbf16, #tpu.memory_space<vmem>>, vector<112x128xbf16>,
    return
  }
  func.func @transform_0(%arg0: i32) -> (i32, i32) {
    %c0_i32 = arith.constant 0 : i32
    %c0_i32_0 = arith.constant 0 : i32
    return %arg0, %c0_i32 : i32, i32
  }
  func.func @transform_1(%arg0: i32) -> (i32, i32) {
    %c0_i32 = arith.constant 0 : i32
    %c0_i32_0 = arith.constant 0 : i32
    %c0_i32_1 = arith.constant 0 : i32
    return %c0_i32, %c0_i32_0 : i32, i32
  }
  func.func @transform_2(%arg0: i32) -> (i32, i32) {
    %c0_i32 = arith.constant 0 : i32
    %c0_i32_0 = arith.constant 0 : i32
    return %arg0, %c0_i32 : i32, i32
  }
}

</mosaic_0001>

<bundles_post_ra>
// kernel: exponential_transform_forward.1
= control target key start
LH: loop header
LB: loop body
LE: loop exit
PB: predicated region body
PF: predicated region fallthrough
CT: control target
= control target key end

     0   :  { %s1023_s9 = smov 0   ;;  %s1025_s10 = smov 0   ;;  %s1165_s0 = inlined_call_operand.vmem [shape: bf16[198,16], index: 0, kind: input, shape index: {}]   ;;  %s1166_s1 = inlined_call_operand.vmem [shape: bf16[16,128], index: 1, kind: input, shape index: {}]   ;;  %s1167_s2 = inlined_call_operand.vmem [shape: bf16[198,128], index: 2, kind: output, shape index: {}]  }
   0x1   :  { %s1027_s11 = smov 0  }
   0x2 LB: > { %s1036_s12 = sadd.s32 4294967295, %s972_s11   ;;  %s1038_s13 = sadd.s32 1, %s972_s11   ;;  %s972_s11 = sphi %s1027_s11, %s1174_s11   ;;  %s968_s10 = sphi %s1025_s10, %s1173_s10   ;;  %s964_s9 = sphi %s1023_s9, %s1172_s9  }
   0x3   : > { %s63_s14 = ssub.s32 %s972_s11, %s1038_s13  ;;  %s66_s15 = sadd.s32 1, %s968_s10 }
   0x4   : > { %p64_p0 = scmp.eq.s32.totalorder %s63_s14, 0  ;;  %p76_p1 = scmp.ne.s32.totalorder %s968_s10, %s964_s9 }
   0x5   : > { %p77_p2 = scmp.eq.s32.totalorder %s1036_s12, 1  ;;  %p675_p3 = scmp.ge.s32.totalorder %s972_s11, 1 }
   0x6   : > { %s1046_s16 = scalar_select %p64_p0, %s968_s10, %s66_s15  }
   0x7   : > { %p1048_p4 = por %p77_p2, %p76_p1  ;;  %p121_p5 = scmp.lt.s32.totalorder %s972_s11, 3 }
   0x9   : > { %p122_p6 = pnand %p675_p3, %p121_p5 }
   0xa   : > { %v906_v0 = vld [vmem:[%s1166_s1] sm:$0xff] (!%p122_p6)   ;;  %v1006_v1 = vmov (!%p122_p6), 0.0   ;;  %s1056_s20 = smul.u32 (!%p122_p6), 14, %s1036_s12  ;;  %vm1007_vm0 = vmmov (!%p122_p6), 0   ;;  %vm223_vm1 = vcmask (!%p122_p6), 130048   ;;  %s143_s26 = sand.u32 (!%p122_p6), 1, %s964_s9  }
   0xb   : > { %125 = sbr.rel (%p122_p6) target bundleno = 335 (0x14f), region = 28  ;;  %782 = vmatprep.subr.bf16.mxu0 (!%p122_p6), %v1006_v1  ;;  %812 = vmatprep.subr.bf16.mxu1 (!%p122_p6), %v1006_v1 }
   0xc   : > { %783 = vmatpush3.bf16.msra.mxu0 (!%p122_p6), %v906_v0  ;;  %784 = vmatprep.mubr.msk.bf16.mxu0 (!%p122_p6), %vm1007_vm0, %v1006_v1  ;;  %p151_p7 = scmp.lt.s32.totalorder (!%p122_p6), %s1056_s20, 24  ;;  %s814_s27 = smul.u32 (!%p122_p6), 56, %s143_s26 }
   0xd   : > { %813 = vmatpush3.bf16.msra.mxu1 (!%p122_p6), %v906_v0  ;;  %800 = vmatprep.mubr.msk.bf16.mxu1 (!%p122_p6), %vm1007_vm0, %v1006_v1 }
   0xe   : > { %s1078_s28 = scalar_lea.vmem (!%p122_p6), [#allocation2], %s814_s27  }
  0x12   : > { %s152_s21 = scalar_select %p151_p7, %s1056_s20, 24 }
  0x13   : > { %s412_s29 = ssub.s32 (%p1048_p4), 25, %s1056_s20  ;;  %s732_s30 = smul.u32 (%p1048_p4), 56, %s1036_s12 }
  0x14   : > { %s676_s22 = sshll.u32 %s152_s21, 2  ;;  %p413_p8 = scmp.lt.s32.totalorder (%p1048_p4), %s412_s29, 14 }
  0x15   : > { %s154_s25 = scalar_lea.vmem %s1165_s0, %s676_s22  ;;  %s1094_s5 = scalar_lea.vmem (%p1048_p4), %s1167_s2, %s732_s30  }
  0x16   : > { %v907_v2 = vld [vmem:[%s154_s25] sm:$0xff]   ;;  %v909_v4 = vld [vmem:[%s154_s25 + $0x8] sm:$0xff]   ;;  %v911_v6 = vld [vmem:[%s154_s25 + $0x10] sm:$0xff]  }
  0x17   : > { %v908_v3 = vld [vmem:[%s154_s25 + $0x20] sm:$0xff]   ;;  %785 = vmatmul.mubr.msk.bf16.vlgmr.msra.gmra.mrb[0].mxu0 %vm223_vm1, %v907_v2  ;;  %v910_v5 = vld [vmem:[%s154_s25 + $0x28] sm:$0xff]   ;;  %v912_v7 = vld [vmem:[%s154_s25 + $0x30] sm:$0xff]  }
  0x18   : > { %801 = vmatmul.mubr.msk.bf16.vlgmr.msra.gmra.mrb[0].mxu1 %vm223_vm1, %v908_v3  ;;  %788 = vmatprep.mubr.msk.bf16.mxu0 %vm1007_vm0, %v1006_v1  ;;  %v913_v8 = vld [vmem:[%s154_s25 + $0x18] sm:$0xff]  }
  0x19   : > { %804 = vmatprep.mubr.msk.bf16.mxu1 %vm1007_vm0, %v1006_v1 }
  0x1f   : > { %789 = vmatmul.mubr.msk.bf16.gmra.mrb[4].mxu0 %vm223_vm1, %v909_v4 }
  0x20   : > { %805 = vmatmul.mubr.msk.bf16.gmra.mrb[4].mxu1 %vm223_vm1, %v910_v5  ;;  %792 = vmatprep.mubr.msk.bf16.mxu0 %vm1007_vm0, %v1006_v1 }
  0x21   : > { %808 = vmatprep.mubr.msk.bf16.mxu1 %vm1007_vm0, %v1006_v1 }
  0x27   : > { %793 = vmatmul.mubr.msk.bf16.gmra.mrb[8].mxu0 %vm223_vm1, %v911_v6 }
  0x28   : > { %809 = vmatmul.mubr.msk.bf16.gmra.mrb[8].mxu1 %vm223_vm1, %v912_v7  ;;  %796 = vmatprep.mubr.msk.bf16.mxu0 %vm1007_vm0, %v1006_v1 }
  0x2f   : > { %797 = vmatmul.mubr.msk.bf16.gmra.mrb[12].mxu0 %vm223_vm1, %v913_v8 }
  0xea   : > { %v279_v9 = vpop.f32.mrb[0].mxu0 }
  0xeb   : > { %v786_v10 = vpop.f32.mrb[1].mxu0  ;;  %v311_v11 = vpop.f32.mrb[0].mxu1 }
  0xec   : > { %v282_v12 = vpop.f32.mrb[2].mxu0  ;;  %v802_v13 = vpop.f32.mrb[1].mxu1 }
  0xed   : > { %v736_v14 = vpack.c.bf16 %v282_v12, %v279_v9  ;;  %v787_v15 = vpop.f32.mrb[3].mxu0  ;;  %v314_v16 = vpop.f32.mrb[2].mxu1 }
  0xee   : > { %v756_v17 = vpack.c.bf16 %v314_v16, %v311_v11  ;;  %v803_v18 = vpop.f32.mrb[3].mxu1 }
  0xef   : > { %737 = vst [vmem:[%s1078_s28] sm:$0xff] %v736_v14  }
  0xf0   : > { %771 = vst [vmem:[%s1078_s28 + $0x20] sm:$0xff] %v756_v17  }
  0xf2   : > { %v287_v19 = vpop.f32.mrb[4].mxu0 }
  0xf3   : > { %v790_v20 = vpop.f32.mrb[5].mxu0  ;;  %v319_v21 = vpop.f32.mrb[4].mxu1 }
  0xf4   : > { %v290_v22 = vpop.f32.mrb[6].mxu0  ;;  %v806_v23 = vpop.f32.mrb[5].mxu1 }
  0xf5   : > { %v741_v24 = vpack.c.bf16 %v290_v22, %v287_v19  ;;  %v791_v25 = vpop.f32.mrb[7].mxu0  ;;  %v322_v26 = vpop.f32.mrb[6].mxu1 }
  0xf6   : > { %v761_v27 = vpack.c.bf16 %v322_v26, %v319_v21  ;;  %v807_v28 = vpop.f32.mrb[7].mxu1 }
  0xf7   : > { %768 = vst [vmem:[%s1078_s28 + $0x8] sm:$0xff] %v741_v24  }
  0xf8   : > { %772 = vst [vmem:[%s1078_s28 + $0x28] sm:$0xff] %v761_v27  }
  0xfa   : > { %v295_v29 = vpop.f32.mrb[8].mxu0 }
  0xfb   : > { %v794_v30 = vpop.f32.mrb[9].mxu0  ;;  %v327_v31 = vpop.f32.mrb[8].mxu1 }
  0xfc   : > { %v298_v32 = vpop.f32.mrb[10].mxu0  ;;  %v810_v33 = vpop.f32.mrb[9].mxu1 }
  0xfd   : > { %v746_v34 = vpack.c.bf16 %v298_v32, %v295_v29  ;;  %v795_v35 = vpop.f32.mrb[11].mxu0  ;;  %v330_v36 = vpop.f32.mrb[10].mxu1 }
  0xfe   : > { %v766_v37 = vpack.c.bf16 %v330_v36, %v327_v31  ;;  %v811_v38 = vpop.f32.mrb[11].mxu1 }
  0xff   : > { %769 = vst [vmem:[%s1078_s28 + $0x10] sm:$0xff] %v746_v34  }
 0x100   : > { %773 = vst [vmem:[%s1078_s28 + $0x30] sm:$0xff] %v766_v37  }
 0x101   : > { %410 = sbr.rel (!%p1048_p4) target bundleno = 335 (0x14f), region = 32 }
 0x102   : > { %v303_v39 = vpop.f32.mrb[12].mxu0 }
 0x103   : > { %v798_v40 = vpop.f32.mrb[13].mxu0 }
 0x104   : > { %v306_v41 = vpop.f32.mrb[14].mxu0 }
 0x105   : > { %v751_v42 = vpack.c.bf16 %v306_v41, %v303_v39  ;;  %v799_v43 = vpop.f32.mrb[15].mxu0 }
 0x107   : > { %770 = vst [vmem:[%s1078_s28 + $0x18] sm:$0xff] %v751_v42  }
 0x108   : > { %s1176_s29 = smov (!%p413_p8, %s412_s29), 14 }
 0x109   : > { %s706_s6 = sshll.u32 %s1176_s29, 6 }
 0x10a   : > { %p709_p9 = scmp.eq.s32.totalorder %s706_s6, 0 }
 0x10b   : > { %914 = sdivrem.u32 (!%p709_p9), %s1176_s29, 14 }
 0x10c   : > { %421 = sbr.rel (%p709_p9) target bundleno = 335 (0x14f), region = 36 }
 0x114   : > { %s1100_s7 = spop.drf %914 }
 0x115   : > { %p710_p10 = scmp.le.s32.totalorder %s1100_s7, 0 }
 0x116   : > { %s1169_s8 = smov (!%p710_p10), %s1094_s5  ;;  %s1170_s9 = smov (!%p710_p10), %s1078_s28 }
 0x117   : > { %628 = sbr.rel (%p710_p10) target bundleno = 306 (0x132), region = 108  ;;  %s1109_s11 = smov (!%p710_p10), 0  }
 0x118   : > { %s1111_s12 = smov (!%p710_p10), 0  }
 0x11e LB: >> { %v438_v44 = vld [vmem:[%s980_s9] sm:$0xf]  ;;  %v440_v45 = vld [vmem:[%s980_s9 + $0x4] sm:$0xf]  ;;  %v442_v46 = vld [vmem:[%s980_s9 + $0x8] sm:$0xf]  ;;  %s988_s12 = sphi %s1111_s12, %s432_s12   ;;  %s984_s11 = sphi %s1109_s11, %s1171_s11   ;;  %s980_s9 = sphi %s1170_s9, %s471_s9   ;;  %s976_s8 = sphi %s1169_s8, %s472_s8  }
 0x11f   : >> { %439 = vst [vmem:[%s976_s8] sm:$0xf] %v438_v44  ;;  %441 = vst [vmem:[%s976_s8 + $0x4] sm:$0xf] %v440_v45  ;;  %v444_v47 = vld [vmem:[%s980_s9 + $0xc] sm:$0xf]  ;;  %s466_s14 = sadd.s32 1, %s984_s11 }
 0x120   : >> { %443 = vst [vmem:[%s976_s8 + $0x8] sm:$0xf] %v442_v46  ;;  %v446_v48 = vld [vmem:[%s980_s9 + $0x10] sm:$0xf]  ;;  %v448_v49 = vld [vmem:[%s980_s9 + $0x14] sm:$0xf]  ;;  %p467_p11 = scmp.ge.s32.totalorder %s466_s14, %s1100_s7 }
 0x121   : >> { %445 = vst [vmem:[%s976_s8 + $0xc] sm:$0xf] %v444_v47  ;;  %447 = vst [vmem:[%s976_s8 + $0x10] sm:$0xf] %v446_v48  ;;  %v450_v50 = vld [vmem:[%s980_s9 + $0x18] sm:$0xf] }
 0x122   : >> { %449 = vst [vmem:[%s976_s8 + $0x14] sm:$0xf] %v448_v49  ;;  %v452_v51 = vld [vmem:[%s980_s9 + $0x1c] sm:$0xf]  ;;  %v454_v52 = vld [vmem:[%s980_s9 + $0x20] sm:$0xf] }
 0x123   : >> { %451 = vst [vmem:[%s976_s8 + $0x18] sm:$0xf] %v450_v50  ;;  %453 = vst [vmem:[%s976_s8 + $0x1c] sm:$0xf] %v452_v51  ;;  %v456_v53 = vld [vmem:[%s980_s9 + $0x24] sm:$0xf] }
 0x124   : >> { %455 = vst [vmem:[%s976_s8 + $0x20] sm:$0xf] %v454_v52  ;;  %v458_v54 = vld [vmem:[%s980_s9 + $0x28] sm:$0xf]  ;;  %v460_v55 = vld [vmem:[%s980_s9 + $0x2c] sm:$0xf] }
 0x125   : >> { %457 = vst [vmem:[%s976_s8 + $0x24] sm:$0xf] %v456_v53  ;;  %459 = vst [vmem:[%s976_s8 + $0x28] sm:$0xf] %v458_v54  ;;  %v462_v56 = vld [vmem:[%s980_s9 + $0x30] sm:$0xf] }
 0x126   : >> { %461 = vst [vmem:[%s976_s8 + $0x2c] sm:$0xf] %v460_v55  ;;  %v464_v57 = vld [vmem:[%s980_s9 + $0x34] sm:$0xf]  ;;  %463 = vst [vmem:[%s976_s8 + $0x30] sm:$0xf] %v462_v56 }
 0x127   : >> { %465 = vst [vmem:[%s976_s8 + $0x34] sm:$0xf] %v464_v57  ;;  %s1178_s14 = smov (%p467_p11, %s466_s14), 0  ;;  %s432_s12 = sadd.s32 1, %s988_s12  }
 0x128   : >> { %s469_s15 = smul.u32 56, %s1178_s14  ;;  %p431_p12 = scmp.ge.s32.totalorder %s432_s12, %s1100_s7 }
 0x129   : >> { %s1171_s11 = smov %s1178_s14 }
 0x12a   : >> { %s471_s9 = scalar_lea.vmem %s1078_s28, %s469_s15 [#allocation2]   ;;  %s472_s8 = scalar_lea.vmem %s1094_s5, %s469_s15  }
 0x12b   : > { %434 = sbr.rel (!%p431_p12) target bundleno = 286 (0x11e), region = 114 }
 0x132 PF: > { %916 = sdivrem.u32 %s1176_s29, 14 }
 0x133   : > { %s711_s17 = smul.u32 56, %s1100_s7 }
 0x135   : > { %s477_s18 = scalar_lea.vmem %s1078_s28, %s711_s17 [#allocation2]   ;;  %s479_s19 = scalar_lea.vmem %s1094_s5, %s711_s17  }
 0x13b   : > { %s917_s20 = spop.drf %916 }
 0x13c   : > { %p713_p13 = scmp.le.s32.totalorder %s917_s20, 0 }
 0x13d   : > { %s990_s21 = smov (!%p713_p13), %s479_s19   ;;  %s994_s22 = smov (!%p713_p13), %s477_s18  }
 0x13e   : > { %642 = sbr.rel (%p713_p13) target bundleno = 335 (0x14f), region = 119  ;;  %s998_s23 = smov (!%p713_p13), 0  }
 0x13f   : > { %s1002_s24 = smov (!%p713_p13), 0  }
 0x145 LB: >> { %v489_v58 = vld [vmem:[%s996_s22] sm:$0xf]  ;;  %s491_s25 = sadd.s32 1, %s1000_s23  ;;  %s483_s24 = sadd.s32 1, %s1004_s24   ;;  %s1004_s24 = sphi %s1002_s24, %s483_s24   ;;  %s1000_s23 = sphi %s998_s23, %s999_s23   ;;  %s996_s22 = sphi %s994_s22, %s496_s22   ;;  %s992_s21 = sphi %s990_s21, %s497_s21  }
 0x146   : >> { %490 = vst [vmem:[%s992_s21] sm:$0xf] %v489_v58  ;;  %p492_p0 = scmp.ge.s32.totalorder %s491_s25, %s917_s20  ;;  %p482_p1 = scmp.ge.s32.totalorder %s483_s24, %s917_s20 }
 0x148   : >> { %s1180_s25 = smov (%p492_p0, %s491_s25), 0  ;;  %485 = sbr.rel (!%p482_p1) target bundleno = 325 (0x145), region = 125 }
 0x149   : >> { %s714_s26 = sshll.u32 %s1180_s25, 2  ;;  %s999_s23 = smov %s1180_s25  }
 0x14a   : >> { %s496_s22 = scalar_lea.vmem %s477_s18, %s714_s26 [#allocation2]   ;;  %s497_s21 = scalar_lea.vmem %s479_s19, %s714_s26  }
 0x14f PF: > { %p9_p2 = scmp.ge.s32.totalorder %s1038_s13, 4   ;;  %s1172_s9 = smov %s968_s10 }
 0x150   : > { %s1173_s10 = smov %s1046_s16  ;;  %s1174_s11 = smov %s1038_s13 }
 0x151   :  { %11 = sbr.rel (!%p9_p2) target bundleno = 2 (0x2), region = 136 }

</bundles_post_ra>
